<compile_context>
chip_gen: v6e
topology: v6e:2x2x1
jax: 0.10.0
libtpu: 0.0.40
codegen_flags: <defaults>
</compile_context>

<pallas_src>
import functools
import math

import jax
import jax.numpy as jnp
from jax import lax
from jax.experimental import pallas as pl
from jax.experimental.pallas import tpu as pltpu


# ---------------------------------------------------------------------------
# In-kernel counter-based random bits (works on TPU Mosaic and in interpret).
# ---------------------------------------------------------------------------
def _random_bits_u32(shape, seed_i32, row0_i32, salt: int):
    """Deterministic uniform uint32 bits keyed by (global row, col, seed, salt)."""
    # Spread the per-layer salt far apart so layers never alias by a small
    # column shift (computed in Python, free at runtime).
    salt32 = (int(salt) * 0x632BE5AB) & 0x7FFFFFFF
    r = lax.broadcasted_iota(jnp.int32, shape, 0) + row0_i32
    c = (lax.broadcasted_iota(jnp.int32, shape, 1)
         + seed_i32 * jnp.int32(0x3504F333) + jnp.int32(salt32))
    x = (r.astype(jnp.uint32) * jnp.uint32(0x9E3779B9)
         + c.astype(jnp.uint32) * jnp.uint32(0x85EBCA6B))
    # splitmix32-style avalanche
    x = x ^ (x >> jnp.uint32(16))
    x = x * jnp.uint32(0x7FEB352D)
    x = x ^ (x >> jnp.uint32(15))
    x = x * jnp.uint32(0x846CA68B)
    x = x ^ (x >> jnp.uint32(16))
    return x


def _dropout(x, p: float, seed_i32, row0_i32, salt: int):
    """Inverted dropout with a pure integer threshold compare (no float convert)."""
    if p <= 0.0:
        return x
    if p >= 1.0:
        return jnp.zeros_like(x)
    # threshold computed in Python/f64 and rounded exactly
    threshold = min(int(round(p * 4294967296.0)), 4294967295)
    bits = _random_bits_u32(x.shape, seed_i32, row0_i32, salt)
    keep = bits >= jnp.uint32(threshold)          # P(keep) = 1 - p
    scale = jnp.float32(1.0 / (1.0 - p))
    return jnp.where(keep, x * scale, jnp.float32(0.0))


# ---------------------------------------------------------------------------
# Kernel: one batch tile, full 3-layer MLP.
# ---------------------------------------------------------------------------
def _mlp_kernel(seed_ref,                         # scalar prefetch (SMEM)
                x_ref, w1_ref, b1_ref, w2_ref, b2_ref, w3_ref, b3_ref,
                o_ref, *, dropout_p, tile_b):
    row0 = pl.program_id(0) * tile_b              # global row offset of this tile
    seed = seed_ref[0]

    # fc1 + ReLU + dropout   (x, w1 are bf16; accumulate f32)
    h = jnp.dot(x_ref[...], w1_ref[...], preferred_element_type=jnp.float32)
    h = h + b1_ref[...]
    h = jnp.maximum(h, 0.0)
    h = _dropout(h, dropout_p, seed, row0, salt=1)

    # fc2 + ReLU + dropout
    h = jnp.dot(h.astype(jnp.bfloat16), w2_ref[...],
                preferred_element_type=jnp.float32)
    h = h + b2_ref[...]
    h = jnp.maximum(h, 0.0)
    h = _dropout(h, dropout_p, seed, row0, salt=2)

    # fc3 (padded to 128 lanes; no activation)
    h = jnp.dot(h.astype(jnp.bfloat16), w3_ref[...],
                preferred_element_type=jnp.float32)
    h = h + b3_ref[...]
    o_ref[...] = h.astype(o_ref.dtype)


# ---------------------------------------------------------------------------
# Wrapper
# ---------------------------------------------------------------------------
def net_forward(x, params, *, dropout_p, seed=0):
    """x: anything reshapable to (-1, 784). Returns (B, 10) float32."""
    x2d = jnp.reshape(x, (-1, 784)).astype(jnp.float32)
    B = x2d.shape[0]
    w1, b1, w2, b2, w3, b3 = params

    # Lane-dense final layer: pad 10 -> 128 output columns.
    w3p = jnp.pad(w3, ((0, 0), (0, 128 - w3.shape[1])))
    b3p = jnp.pad(b3, ((0, 0), (0, 128 - b3.shape[1])))

    # bf16 weights / activations for the MXU; biases stay f32.
    w1b = w1.astype(jnp.bfloat16)
    w2b = w2.astype(jnp.bfloat16)
    w3b = w3p.astype(jnp.bfloat16)

    # Batch tiling: rows padded to a multiple of 16 (bf16 sublane packing).
    # 512-row tiles double-buffered are ~2 MiB — safe on 64 MiB (v7x) and
    # 128 MiB (v5e/v6e) VMEM.
    MAX_TILE_B = 512
    B_pad = ((B + 15) // 16) * 16
    if B_pad <= MAX_TILE_B:
        tile_b = B_pad
    else:
        tile_b = MAX_TILE_B
        B_pad = ((B + MAX_TILE_B - 1) // MAX_TILE_B) * MAX_TILE_B

    xb = x2d.astype(jnp.bfloat16)
    if B_pad != B:
        xb = jnp.pad(xb, ((0, B_pad - B), (0, 0)))

    grid = (B_pad // tile_b,)
    seed_arr = jnp.asarray([seed], dtype=jnp.int32)

    kernel = functools.partial(_mlp_kernel,
                               dropout_p=float(dropout_p), tile_b=tile_b)

    weight_bytes = (784 * 256 + 256 * 128 + 128 * 128) * 2 + (256 + 128 + 128) * 4
    cost = pl.CostEstimate(
        flops=2 * B_pad * (784 * 256 + 256 * 128 + 128 * 128),
        transcendentals=0,
        bytes_accessed=B_pad * 784 * 2 + B_pad * 128 * 4 + weight_bytes,
    )

    out = pl.pallas_call(
        kernel,
        out_shape=jax.ShapeDtypeStruct((B_pad, 128), jnp.float32),
        grid_spec=pltpu.PrefetchScalarGridSpec(
            num_scalar_prefetch=1,
            grid=grid,
            in_specs=[
                pl.BlockSpec((tile_b, 784), lambda i, s: (i, 0)),   # x tile
                pl.BlockSpec((784, 256), lambda i, s: (0, 0)),      # w1 (resident)
                pl.BlockSpec((1, 256), lambda i, s: (0, 0)),        # b1
                pl.BlockSpec((256, 128), lambda i, s: (0, 0)),      # w2
                pl.BlockSpec((1, 128), lambda i, s: (0, 0)),        # b2
                pl.BlockSpec((128, 128), lambda i, s: (0, 0)),      # w3 (padded)
                pl.BlockSpec((1, 128), lambda i, s: (0, 0)),        # b3 (padded)
            ],
            out_specs=pl.BlockSpec((tile_b, 128), lambda i, s: (i, 0)),
        ),
        compiler_params=pltpu.CompilerParams(
            dimension_semantics=("parallel",)),
        cost_estimate=cost,
    )(seed_arr, xb, w1b, b1, w2b, b2, w3b, b3p)

    return out[:B, :10]


def init_params(key):
    """Deterministic init mirroring the PyTorch module's __init__."""
    k1, k2, k3, kb1, kb2, kb3 = jax.random.split(key, 6)

    # fc1: kaiming_uniform_ (a=0, fan_in=784, gain=sqrt(2))
    bound1 = math.sqrt(2.0) * math.sqrt(3.0 / 784)
    w1 = jax.random.uniform(k1, (784, 256), jnp.float32, -bound1, bound1)

    # fc2: xavier_normal_ (fan_in=256, fan_out=128)
    std2 = math.sqrt(2.0 / (256 + 128))
    w2 = jax.random.normal(k2, (256, 128), jnp.float32) * std2

    # fc3: normal_ mean=0 std=1
    w3 = jax.random.normal(k3, (128, 10), jnp.float32)

    # biases: PyTorch default Linear bias init U(-1/sqrt(fan_in), 1/sqrt(fan_in))
    def bias(k, fan_in, n):
        bnd = 1.0 / math.sqrt(fan_in)
        return jax.random.uniform(k, (1, n), jnp.float32, -bnd, bnd)

    b1 = bias(kb1, 784, 256)
    b2 = bias(kb2, 256, 128)
    b3 = bias(kb3, 128, 10)
    return (w1, b1, w2, b2, w3, b3)


if __name__ == "__main__":
    key = jax.random.PRNGKey(0)
    kp, kx = jax.random.split(key)

    params = init_params(kp)

    # MNIST-like batch: (B, 1, 28, 28) NCHW -> flattened to (B, 784)
    B = 8
    x = jax.random.normal(kx, (B, 1, 28, 28), jnp.float32)

    # training-mode forward with dropout
    out = net_forward(x, params, dropout_p=0.25, seed=1234)
    out = jax.block_until_ready(out)
    assert out.shape == (B, 10), out.shape
    assert bool(jnp.all(jnp.isfinite(out)))

    # sanity: with p=0 the kernel matches a plain-JAX bf16 reference
    out_nodrop = jax.block_until_ready(
        net_forward(x, params, dropout_p=0.0, seed=1234))
    w1, b1, w2, b2, w3, b3 = params
    xr = jnp.reshape(x, (-1, 784)).astype(jnp.bfloat16)
    h = jnp.maximum(jnp.dot(xr, w1.astype(jnp.bfloat16),
                            preferred_element_type=jnp.float32) + b1, 0.0)
    h = jnp.maximum(jnp.dot(h.astype(jnp.bfloat16), w2.astype(jnp.bfloat16),
                            preferred_element_type=jnp.float32) + b2, 0.0)
    ref = jnp.dot(h.astype(jnp.bfloat16), w3.astype(jnp.bfloat16),
                  preferred_element_type=jnp.float32) + b3
    assert jnp.allclose(out_nodrop, ref, atol=2e-2, rtol=2e-2)

    print("KERNEL_OK")
</pallas_src>

<mosaic_0001>
module attributes {stable_mosaic.version = 11 : i64} {
  func.func @_mlp_kernel(%arg0: i32, %arg1: memref<1xi32, #tpu.memory_space<smem>>, %arg2: memref<16x784xbf16, #tpu.memory_space<vmem>>, %arg3: memref<784x256xbf16, #tpu.memory_space<vmem>>, %arg4: memref<1x256xf32, #tpu.memory_space<vmem>>, %arg5: memref<256x128xbf16, #tpu.memory_space<vmem>>, %arg6: memref<1x128xf32, #tpu.memory_space<vmem>>, %arg7: memref<128x128xbf16, #tpu.memory_space<vmem>>, %arg8: memref<1x128xf32, #tpu.memory_space<vmem>>, %arg9: memref<16x128xf32, #tpu.memory_space<vmem>>) attributes {dimension_semantics = [#tpu.dimension_semantics<parallel>], iteration_bounds = array<i64: 1>, scalar_prefetch = 1 : i64, scratch_operands = 0 : i64, tpu.core_type = #tpu.core_type<tc>, window_params = [{transform_indices = @transform_0, window_bounds = array<i64: 16, 784>}, {pipeline_mode = #tpu.pipeline_mode<synchronous>, transform_indices = @transform_1, window_bounds = array<i64: 784, 256>}, {pipeline_mode = #tpu.pipeline_mode<synchronous>, transform_indices = @transform_2, window_bounds = array<i64: 1, 256>}, {pipeline_mode = #tpu.pipeline_mode<synchronous>, transform_indices = @transform_3, window_bounds = array<i64: 256, 128>}, {pipeline_mode = #tpu.pipeline_mode<synchronous>, transform_indices = @transform_4, window_bounds = array<i64: 1, 128>}, {pipeline_mode = #tpu.pipeline_mode<synchronous>, transform_indices = @transform_5, window_bounds = array<i64: 128, 128>}, {pipeline_mode = #tpu.pipeline_mode<synchronous>, transform_indices = @transform_6, window_bounds = array<i64: 1, 128>}, {transform_indices = @transform_7, window_bounds = array<i64: 16, 128>}]} {
    %c16_i32 = arith.constant 16 : i32
    %0 = arith.muli %arg0, %c16_i32 : i32
    %c0 = arith.constant 0 : index
    %1 = memref.load %arg1[%c0] : memref<1xi32, #tpu.memory_space<smem>>
    %c0_0 = arith.constant 0 : index
    %c0_1 = arith.constant 0 : index
    %2 = vector.load %arg2[%c0_0, %c0_1] : memref<16x784xbf16, #tpu.memory_space<vmem>>, vector<16x784xbf16>
    %c0_2 = arith.constant 0 : index
    %c0_3 = arith.constant 0 : index
    %3 = vector.load %arg3[%c0_2, %c0_3] : memref<784x256xbf16, #tpu.memory_space<vmem>>, vector<784x256xbf16>
    %cst = arith.constant dense<0.000000e+00> : vector<16x256xf32>
    %4 = tpu.matmul %2, %3, %cst {dimension_numbers = #tpu.dot_dimension_numbers<[1], [0], [0], [1], [0, 0, 1, 1], [], []>} : vector<16x784xbf16>, vector<784x256xbf16>, vector<16x256xf32> -> vector<16x256xf32>
    %c0_4 = arith.constant 0 : index
    %c0_5 = arith.constant 0 : index
    %5 = vector.load %arg4[%c0_4, %c0_5] : memref<1x256xf32, #tpu.memory_space<vmem>>, vector<1x256xf32>
    %6 = vector.broadcast %5 : vector<1x256xf32> to vector<16x256xf32>
    %7 = arith.addf %4, %6 : vector<16x256xf32>
    %cst_6 = arith.constant 0.000000e+00 : f32
    %8 = vector.broadcast %cst_6 : f32 to vector<16x256xf32>
    %9 = arith.maximumf %7, %8 : vector<16x256xf32>
    %10 = tpu.iota {dimensions = array<i32: 0>} : vector<16x256xi32>
    %11 = vector.broadcast %0 : i32 to vector<16x256xi32>
    %12 = arith.addi %10, %11 : vector<16x256xi32>
    %13 = tpu.iota {dimensions = array<i32: 1>} : vector<16x256xi32>
    %c889516851_i32 = arith.constant 889516851 : i32
    %14 = arith.muli %1, %c889516851_i32 : i32
    %15 = vector.broadcast %14 : i32 to vector<16x256xi32>
    %16 = arith.addi %13, %15 : vector<16x256xi32>
    %c1663821227_i32 = arith.constant 1663821227 : i32
    %17 = vector.broadcast %c1663821227_i32 : i32 to vector<16x256xi32>
    %18 = arith.addi %16, %17 : vector<16x256xi32>
    %c-1640531527_i32 = arith.constant -1640531527 : i32
    %19 = vector.broadcast %c-1640531527_i32 : i32 to vector<16x256xi32>
    %20 = arith.muli %12, %19 : vector<16x256xi32>
    %c-2048144789_i32 = arith.constant -2048144789 : i32
    %21 = vector.broadcast %c-2048144789_i32 : i32 to vector<16x256xi32>
    %22 = arith.muli %18, %21 : vector<16x256xi32>
    %23 = arith.addi %20, %22 : vector<16x256xi32>
    %c16_i32_7 = arith.constant 16 : i32
    %24 = vector.broadcast %c16_i32_7 : i32 to vector<16x256xi32>
    %25 = arith.shrui %23, %24 : vector<16x256xi32>
    %26 = arith.xori %23, %25 : vector<16x256xi32>
    %c2146121005_i32 = arith.constant 2146121005 : i32
    %27 = vector.broadcast %c2146121005_i32 : i32 to vector<16x256xi32>
    %28 = arith.muli %26, %27 : vector<16x256xi32>
    %c15_i32 = arith.constant 15 : i32
    %29 = vector.broadcast %c15_i32 : i32 to vector<16x256xi32>
    %30 = arith.shrui %28, %29 : vector<16x256xi32>
    %31 = arith.xori %28, %30 : vector<16x256xi32>
    %c-2073254261_i32 = arith.constant -2073254261 : i32
    %32 = vector.broadcast %c-2073254261_i32 : i32 to vector<16x256xi32>
    %33 = arith.muli %31, %32 : vector<16x256xi32>
    %c16_i32_8 = arith.constant 16 : i32
    %34 = vector.broadcast %c16_i32_8 : i32 to vector<16x256xi32>
    %35 = arith.shrui %33, %34 : vector<16x256xi32>
    %36 = arith.xori %33, %35 : vector<16x256xi32>
    %c1073741824_i32 = arith.constant 1073741824 : i32
    %37 = vector.broadcast %c1073741824_i32 : i32 to vector<16x256xi32>
    %38 = arith.cmpi uge, %36, %37 : vector<16x256xi32>
    %cst_9 = arith.constant 1.33333337 : f32
    %39 = vector.broadcast %cst_9 : f32 to vector<16x256xf32>
    %40 = arith.mulf %9, %39 : vector<16x256xf32>
    %cst_10 = arith.constant 0.000000e+00 : f32
    %41 = vector.broadcast %cst_10 : f32 to vector<16x256xf32>
    %42 = arith.select %38, %40, %41 : vector<16x256xi1>, vector<16x256xf32>
    %43 = arith.truncf %42 : vector<16x256xf32> to vector<16x256xbf16>
    %c0_11 = arith.constant 0 : index
    %c0_12 = arith.constant 0 : index
    %44 = vector.load %arg5[%c0_11, %c0_12] : memref<256x128xbf16, #tpu.memory_space<vmem>>, vector<256x128xbf16>
    %cst_13 = arith.constant dense<0.000000e+00> : vector<16x128xf32>
    %45 = tpu.matmul %43, %44, %cst_13 {dimension_numbers = #tpu.dot_dimension_numbers<[1], [0], [0], [1], [0, 0, 1, 1], [], []>} : vector<16x256xbf16>, vector<256x128xbf16>, vector<16x128xf32> -> vector<16x128xf32>
    %c0_14 = arith.constant 0 : index
    %c0_15 = arith.constant 0 : index
    %46 = vector.load %arg6[%c0_14, %c0_15] : memref<1x128xf32, #tpu.memory_space<vmem>>, vector<1x128xf32>
    %47 = vector.broadcast %46 : vector<1x128xf32> to vector<16x128xf32>
    %48 = arith.addf %45, %47 : vector<16x128xf32>
    %cst_16 = arith.constant 0.000000e+00 : f32
    %49 = vector.broadcast %cst_16 : f32 to vector<16x128xf32>
    %50 = arith.maximumf %48, %49 : vector<16x128xf32>
    %51 = tpu.iota {dimensions = array<i32: 0>} : vector<16x128xi32>
    %52 = vector.broadcast %0 : i32 to vector<16x128xi32>
    %53 = arith.addi %51, %52 : vector<16x128xi32>
    %54 = tpu.iota {dimensions = array<i32: 1>} : vector<16x128xi32>
    %c889516851_i32_17 = arith.constant 889516851 : i32
    %55 = arith.muli %1, %c889516851_i32_17 : i32
    %56 = vector.broadcast %55 : i32 to vector<16x128xi32>
    %57 = arith.addi %54, %56 : vector<16x128xi32>
    %c1180158806_i32 = arith.constant 1180158806 : i32
    %58 = vector.broadcast %c1180158806_i32 : i32 to vector<16x128xi32>
    %59 = arith.addi %57, %58 : vector<16x128xi32>
    %c-1640531527_i32_18 = arith.constant -1640531527 : i32
    %60 = vector.broadcast %c-1640531527_i32_18 : i32 to vector<16x128xi32>
    %61 = arith.muli %53, %60 : vector<16x128xi32>
    %c-2048144789_i32_19 = arith.constant -2048144789 : i32
    %62 = vector.broadcast %c-2048144789_i32_19 : i32 to vector<16x128xi32>
    %63 = arith.muli %59, %62 : vector<16x128xi32>
    %64 = arith.addi %61, %63 : vector<16x128xi32>
    %c16_i32_20 = arith.constant 16 : i32
    %65 = vector.broadcast %c16_i32_20 : i32 to vector<16x128xi32>
    %66 = arith.shrui %64, %65 : vector<16x128xi32>
    %67 = arith.xori %64, %66 : vector<16x128xi32>
    %c2146121005_i32_21 = arith.constant 2146121005 : i32
    %68 = vector.broadcast %c2146121005_i32_21 : i32 to vector<16x128xi32>
    %69 = arith.muli %67, %68 : vector<16x128xi32>
    %c15_i32_22 = arith.constant 15 : i32
    %70 = vector.broadcast %c15_i32_22 : i32 to vector<16x128xi32>
    %71 = arith.shrui %69, %70 : vector<16x128xi32>
    %72 = arith.xori %69, %71 : vector<16x128xi32>
    %c-2073254261_i32_23 = arith.constant -2073254261 : i32
    %73 = vector.broadcast %c-2073254261_i32_23 : i32 to vector<16x128xi32>
    %74 = arith.muli %72, %73 : vector<16x128xi32>
    %c16_i32_24 = arith.constant 16 : i32
    %75 = vector.broadcast %c16_i32_24 : i32 to vector<16x128xi32>
    %76 = arith.shrui %74, %75 : vector<16x128xi32>
    %77 = arith.xori %74, %76 : vector<16x128xi32>
    %c1073741824_i32_25 = arith.constant 1073741824 : i32
    %78 = vector.broadcast %c1073741824_i32_25 : i32 to vector<16x128xi32>
    %79 = arith.cmpi uge, %77, %78 : vector<16x128xi32>
    %cst_26 = arith.constant 1.33333337 : f32
    %80 = vector.broadcast %cst_26 : f32 to vector<16x128xf32>
    %81 = arith.mulf %50, %80 : vector<16x128xf32>
    %cst_27 = arith.constant 0.000000e+00 : f32
    %82 = vector.broadcast %cst_27 : f32 to vector<16x128xf32>
    %83 = arith.select %79, %81, %82 : vector<16x128xi1>, vector<16x128xf32>
    %84 = arith.truncf %83 : vector<16x128xf32> to vector<16x128xbf16>
    %c0_28 = arith.constant 0 : index
    %c0_29 = arith.constant 0 : index
    %85 = vector.load %arg7[%c0_28, %c0_29] : memref<128x128xbf16, #tpu.memory_space<vmem>>, vector<128x128xbf16>
    %cst_30 = arith.constant dense<0.000000e+00> : vector<16x128xf32>
    %86 = tpu.matmul %84, %85, %cst_30 {dimension_numbers = #tpu.dot_dimension_numbers<[1], [0], [0], [1], [0, 0, 1, 1], [], []>} : vector<16x128xbf16>, vector<128x128xbf16>, vector<16x128xf32> -> vector<16x128xf32>
    %c0_31 = arith.constant 0 : index
    %c0_32 = arith.constant 0 : index
    %87 = vector.load %arg8[%c0_31, %c0_32] : memref<1x128xf32, #tpu.memory_space<vmem>>, vector<1x128xf32>
    %88 = vector.broadcast %87 : vector<1x128xf32> to vector<16x128xf32>
    %89 = arith.addf %86, %88 : vector<16x128xf32>
    %c0_33 = arith.constant 0 : index
    %c0_34 = arith.constant 0 : index
    %90 = vector.load %arg9[%c0_33, %c0_34] : memref<16x128xf32, #tpu.memory_space<vmem>>, vector<16x128xf32>
    tpu.vector_store %arg9[%c0_33, %c0_34], %89 {strides = array<i32>} : memref<16x128xf32, #tpu.memory_space<vmem>>, vector<16x128xf32>,
    return
  }
  func.func @transform_0(%arg0: i32, %arg1: memref<1xi32, #tpu.memory_space<smem>>) -> (i32, i32) {
    %c0_i32 = arith.constant 0 : i32
    %c0_i32_0 = arith.constant 0 : i32
    return %arg0, %c0_i32 : i32, i32
  }
  func.func @transform_1(%arg0: i32, %arg1: memref<1xi32, #tpu.memory_space<smem>>) -> (i32, i32) {
    %c0_i32 = arith.constant 0 : i32
    %c0_i32_0 = arith.constant 0 : i32
    %c0_i32_1 = arith.constant 0 : i32
    return %c0_i32, %c0_i32_0 : i32, i32
  }
  func.func @transform_2(%arg0: i32, %arg1: memref<1xi32, #tpu.memory_space<smem>>) -> (i32, i32) {
    %c0_i32 = arith.constant 0 : i32
    %c0_i32_0 = arith.constant 0 : i32
    %c0_i32_1 = arith.constant 0 : i32
    return %c0_i32, %c0_i32_0 : i32, i32
  }
  func.func @transform_3(%arg0: i32, %arg1: memref<1xi32, #tpu.memory_space<smem>>) -> (i32, i32) {
    %c0_i32 = arith.constant 0 : i32
    %c0_i32_0 = arith.constant 0 : i32
    %c0_i32_1 = arith.constant 0 : i32
    return %c0_i32, %c0_i32_0 : i32, i32
  }
  func.func @transform_4(%arg0: i32, %arg1: memref<1xi32, #tpu.memory_space<smem>>) -> (i32, i32) {
    %c0_i32 = arith.constant 0 : i32
    %c0_i32_0 = arith.constant 0 : i32
    %c0_i32_1 = arith.constant 0 : i32
    return %c0_i32, %c0_i32_0 : i32, i32
  }
  func.func @transform_5(%arg0: i32, %arg1: memref<1xi32, #tpu.memory_space<smem>>) -> (i32, i32) {
    %c0_i32 = arith.constant 0 : i32
    %c0_i32_0 = arith.constant 0 : i32
    %c0_i32_1 = arith.constant 0 : i32
    return %c0_i32, %c0_i32_0 : i32, i32
  }
  func.func @transform_6(%arg0: i32, %arg1: memref<1xi32, #tpu.memory_space<smem>>) -> (i32, i32) {
    %c0_i32 = arith.constant 0 : i32
    %c0_i32_0 = arith.constant 0 : i32
    %c0_i32_1 = arith.constant 0 : i32
    return %c0_i32, %c0_i32_0 : i32, i32
  }
  func.func @transform_7(%arg0: i32, %arg1: memref<1xi32, #tpu.memory_space<smem>>) -> (i32, i32) {
    %c0_i32 = arith.constant 0 : i32
    %c0_i32_0 = arith.constant 0 : i32
    return %arg0, %c0_i32 : i32, i32
  }
}

</mosaic_0001>

<bundles_post_ra>
// kernel: tpu_custom_call.1
= control target key start
LH: loop header
LB: loop body
LE: loop exit
PB: predicated region body
PF: predicated region fallthrough
CT: control target
= control target key end

     0   :  { %14 = vsyncpa [#allocation5], 0  ;;  %s1927_s0 = inlined_call_operand.<no memory space> [shape: s32[1], index: 0, kind: input, shape index: {}]   ;;  %s1928_s1 = inlined_call_operand.hbm [shape: bf16[16,784], index: 1, kind: input, shape index: {}]   ;;  %s1929_s2 = inlined_call_operand.hbm [shape: bf16[784,256], index: 2, kind: input, shape index: {}]   ;;  %s1930_s3 = inlined_call_operand.vmem [shape: f32[1,256], index: 3, kind: input, shape index: {}]   ;;  %s1931_s4 = inlined_call_operand.hbm [shape: bf16[256,128], index: 4, kind: input, shape index: {}]   ;;  %s1932_s5 = inlined_call_operand.vmem [shape: f32[1,128], index: 5, kind: input, shape index: {}]   ;;  %s1933_s6 = inlined_call_operand.hbm [shape: bf16[128,128], index: 6, kind: input, shape index: {}]   ;;  %s1934_s7 = inlined_call_operand.vmem [shape: f32[1,128], index: 7, kind: input, shape index: {}]   ;;  %s1935_s8 = inlined_call_operand.hbm [shape: f32[16,128], index: 8, kind: output, shape index: {}]  }
   0x1   :  { %15 = vsyncpa [#allocation8], 0 }
   0x2   :  { %16 = vsyncpa [#allocation11], 0 }
   0x3   :  { %17 = vsyncpa [#allocation6], 0  ;;  %s1812_s27 = smov [#allocation7]  }
   0x4   :  { %s35_s28 = sshll.u32 %s1812_s27, 4  ;;  %s36_s28 = int_to_ptr.vmem [resolvable:$true] %s35_s28 }
   0x5   :  { %s1712_s29 = scalar_lea.vmem %s36_s28, 12544  ;;  %p1717_p1 = scmp.lt.s32.totalorder %s36_s28, %s36_s28 }
   0x6   :  { %p1713_p0 = scmp.ne.s32.totalorder %s36_s28, %s1712_s29  ;;  %p1718_p2 = scmp.lt.s32.totalorder %s1712_s29, %s1712_s29 }
   0x8   :  { %p1719_p3 = por %p1718_p2, %p1717_p1 }
   0xa   :  { %p1720_p4 = pnand %p1719_p3, %p1713_p0 }
   0xc   :  { %1723 = shalt.err (!%p1720_p4)
}
   0xd   :  { %s1813_s30 = smov 128   ;;  %s1814_s9 = smov 8  }
   0xe   :  { %41 = dma.hbm_to_vmem [thread:$0]  %s1929_s2, 12544, %s36_s28, [#allocation8], %s1813_s30, %s1813_s30, %s1814_s9  }
   0xf   :  { %s1815_s12 = smov [#allocation4]  }
  0x10   :  { %s23_s13 = sshll.u32 %s1815_s12, 4  ;;  %s24_s13 = int_to_ptr.vmem [resolvable:$true] %s23_s13 }
  0x11   :  { %s1732_s14 = scalar_lea.vmem %s24_s13, 896  ;;  %p1737_p6 = scmp.lt.s32.totalorder %s24_s13, %s24_s13 }
  0x12   :  { %p1733_p5 = scmp.ne.s32.totalorder %s24_s13, %s1732_s14  ;;  %p1738_p7 = scmp.lt.s32.totalorder %s1732_s14, %s1732_s14 }
  0x14   :  { %p1739_p8 = por %p1738_p7, %p1737_p6 }
  0x16   :  { %p1740_p9 = pnand %p1739_p8, %p1733_p5 }
  0x18   :  { %1743 = shalt.err (!%p1740_p9)
}
  0x19   :  { %s1816_s15 = smov 448   ;;  %s1817_s16 = smov 28  }
  0x1a   :  { %29 = dma.hbm_to_vmem [thread:$0]  %s1928_s1, 896, %s24_s13, [#allocation5], %s1816_s15, %s1816_s15, %s1817_s16  }
  0x1b   :  { %s1818_s19 = smov [#allocation9]  }
  0x1c   :  { %s49_s20 = sshll.u32 %s1818_s19, 4  ;;  %s50_s20 = int_to_ptr.vmem [resolvable:$true] %s49_s20 }
  0x1d   :  { %s1752_s2 = scalar_lea.vmem %s50_s20, 2048  ;;  %p1757_p11 = scmp.lt.s32.totalorder %s50_s20, %s50_s20 }
  0x1e   :  { %p1753_p10 = scmp.ne.s32.totalorder %s50_s20, %s1752_s2  ;;  %p1758_p12 = scmp.lt.s32.totalorder %s1752_s2, %s1752_s2 }
  0x20   :  { %p1759_p13 = por %p1758_p12, %p1757_p11 }
  0x22   :  { %p1760_p0 = pnand %p1759_p13, %p1753_p10 }
  0x24   :  { %1763 = shalt.err (!%p1760_p0)
}
  0x25   :  { %s1819_s21 = smov 64   ;;  %s1820_s22 = smov 4  }
  0x26   :  { %55 = dma.hbm_to_vmem [thread:$0]  %s1931_s4, 2048, %s50_s20, [#allocation8], %s1819_s21, %s1819_s21, %s1820_s22  }
  0x27   :  { %s1821_s25 = smov [#allocation10]  }
  0x28   :  { %s63_s26 = sshll.u32 %s1821_s25, 4  ;;  %s64_s26 = int_to_ptr.vmem [resolvable:$true] %s63_s26 }
  0x29   :  { %s1772_s1 = scalar_lea.vmem %s64_s26, 1024  ;;  %p1777_p2 = scmp.lt.s32.totalorder %s64_s26, %s64_s26 }
  0x2a   :  { %p1773_p1 = scmp.ne.s32.totalorder %s64_s26, %s1772_s1  ;;  %p1778_p3 = scmp.lt.s32.totalorder %s1772_s1, %s1772_s1 }
  0x2c   :  { %p1779_p4 = por %p1778_p3, %p1777_p2 }
  0x2e   :  { %p1780_p5 = pnand %p1779_p4, %p1773_p1 }
  0x30   :  { %1783 = shalt.err (!%p1780_p5)
}
  0x31   :  { %69 = dma.hbm_to_vmem [thread:$0]  %s1933_s6, 1024, %s64_s26, [#allocation11], %s1819_s21, %s1819_s21, %s1820_s22  }
  0x32   :  { %1804 = dma.done.wait [#allocation5], 896  }
  0x33   :  { %1805 = vsyncadd [#allocation5], 4294966400 }
  0x34   :  { %1806 = dma.done.wait [#allocation8], 14592  }
  0x35   :  { %1807 = vsyncadd [#allocation8], 4294952704 }
  0x36   :  { %1808 = dma.done.wait [#allocation11], 1024  }
  0x37   :  { %1809 = vsyncadd [#allocation11], 4294966272  ;;  %v1523_v0 = vld [vmem:[#allocation7 + $0x74] ss:$8 sps:$4 sm:$0xff]   ;;  %v1525_v1 = vld [vmem:[#allocation7 + $0x70] ss:$8 sps:$4 sm:$0xff]  }
  0x38   :  { %734 = vmatprep.subr.bf16.mxu0 %v1523_v0  ;;  %v1526_v2 = vld [vmem:[#allocation7 + $0x174] ss:$8 sps:$4 sm:$0xff]   ;;  %v1528_v3 = vld [vmem:[#allocation7 + $0x170] ss:$8 sps:$4 sm:$0xff]   ;;  %v1529_v4 = vld [vmem:[#allocation7 + $0x64] ss:$8 sps:$4 sm:$0xff]  }
  0x39   :  { %735 = vmatpush1.bf16.msra.mxu0 %v1525_v1  ;;  %v1531_v5 = vld [vmem:[#allocation7 + $0x60] ss:$8 sps:$4 sm:$0xff]   ;;  %777 = vmatprep.subr.bf16.mxu1 %v1526_v2  ;;  %v1532_v6 = vld [vmem:[#allocation7 + $0x164] ss:$8 sps:$4 sm:$0xff]   ;;  %v1535_v8 = vld [vmem:[#allocation7 + $0x54] ss:$8 sps:$4 sm:$0xff]  }
  0x3a   :  { %778 = vmatpush1.bf16.msra.mxu1 %v1528_v3  ;;  %736 = vmatprep.subr.bf16.mxu0 %v1529_v4  ;;  %v1534_v7 = vld [vmem:[#allocation7 + $0x160] ss:$8 sps:$4 sm:$0xff]   ;;  %v1537_v9 = vld [vmem:[#allocation7 + $0x50] ss:$8 sps:$4 sm:$0xff]   ;;  %v1538_v10 = vld [vmem:[#allocation7 + $0x154] ss:$8 sps:$4 sm:$0xff]  }
  0x3b   :  { %779 = vmatprep.subr.bf16.mxu1 %v1532_v6  ;;  %v1541_v11 = vld [vmem:[#allocation7 + $0x44] ss:$8 sps:$4 sm:$0xff]   ;;  %v1540_v12 = vld [vmem:[#allocation7 + $0x150] ss:$8 sps:$4 sm:$0xff]   ;;  %v1543_v14 = vld [vmem:[#allocation7 + $0x40] ss:$8 sps:$4 sm:$0xff]  }
  0x3c   :  { %v1544_v13 = vld [vmem:[#allocation7 + $0x144] ss:$8 sps:$4 sm:$0xff]   ;;  %v1547_v15 = vld [vmem:[#allocation7 + $0x34] ss:$8 sps:$4 sm:$0xff]   ;;  %v1546_v16 = vld [vmem:[#allocation7 + $0x140] ss:$8 sps:$4 sm:$0xff]  }
  0x3d   :  { %737 = vmatpush1.bf16.msra.mxu0 %v1531_v5  ;;  %v1550_v17 = vld [vmem:[#allocation7 + $0x134] ss:$8 sps:$4 sm:$0xff]   ;;  %v1549_v18 = vld [vmem:[#allocation7 + $0x30] ss:$8 sps:$4 sm:$0xff]   ;;  %v1553_v19 = vld [vmem:[#allocation7 + $0x24] ss:$8 sps:$4 sm:$0xff]  }
  0x3e   :  { %738 = vmatprep.subr.bf16.mxu0 %v1535_v8  ;;  %780 = vmatpush1.bf16.msra.mxu1 %v1534_v7  ;;  %v1552_v20 = vld [vmem:[#allocation7 + $0x130] ss:$8 sps:$4 sm:$0xff]   ;;  %v1556_v21 = vld [vmem:[#allocation7 + $0x124] ss:$8 sps:$4 sm:$0xff]   ;;  %v1555_v22 = vld [vmem:[#allocation7 + $0x20] ss:$8 sps:$4 sm:$0xff]  }
  0x3f   :  { %781 = vmatprep.subr.bf16.mxu1 %v1538_v10  ;;  %v1559_v23 = vld [vmem:[#allocation7 + $0x14] ss:$8 sps:$4 sm:$0xff]   ;;  %v1558_v24 = vld [vmem:[#allocation7 + $0x120] ss:$8 sps:$4 sm:$0xff]   ;;  %v1561_v26 = vld [vmem:[#allocation7 + $0x10] ss:$8 sps:$4 sm:$0xff]  }
  0x40   :  { %v1562_v25 = vld [vmem:[#allocation7 + $0x114] ss:$8 sps:$4 sm:$0xff]   ;;  %v1565_v27 = vld [vmem:[#allocation7 + $0x4] ss:$8 sps:$4 sm:$0xff]   ;;  %v1564_v28 = vld [vmem:[#allocation7 + $0x110] ss:$8 sps:$4 sm:$0xff]  }
  0x41   :  { %739 = vmatpush1.bf16.msra.mxu0 %v1537_v9  ;;  %v1568_v29 = vld [vmem:[#allocation7 + $0x104] ss:$8 sps:$4 sm:$0xff]   ;;  %v1567_v30 = vld [vmem:[#allocation7] ss:$8 sps:$4 sm:$0xff]   ;;  %v1571_v31 = vld [vmem:[#allocation7 + $0xf4] ss:$8 sps:$4 sm:$0xff]  }
  0x42   :  { %740 = vmatprep.subr.bf16.mxu0 %v1541_v11  ;;  %782 = vmatpush1.bf16.msra.mxu1 %v1540_v12  ;;  %v1570_v32 = vld [vmem:[#allocation7 + $0x100] ss:$8 sps:$4 sm:$0xff]   ;;  %v1574_v33 = vld [vmem:[#allocation7 + $0x1f4] ss:$8 sps:$4 sm:$0xff]   ;;  %v1573_v34 = vld [vmem:[#allocation7 + $0xf0] ss:$8 sps:$4 sm:$0xff]  }
  0x43   :  { %783 = vmatprep.subr.bf16.mxu1 %v1544_v13  ;;  %v1577_v35 = vld [vmem:[#allocation7 + $0xe4] ss:$8 sps:$4 sm:$0xff]   ;;  %v1576_v36 = vld [vmem:[#allocation7 + $0x1f0] ss:$8 sps:$4 sm:$0xff]   ;;  %v1579_v38 = vld [vmem:[#allocation7 + $0xe0] ss:$8 sps:$4 sm:$0xff]  }
  0x44   :  { %v1580_v37 = vld [vmem:[#allocation7 + $0x1e4] ss:$8 sps:$4 sm:$0xff]   ;;  %v1583_v39 = vld [vmem:[#allocation7 + $0xd4] ss:$8 sps:$4 sm:$0xff]   ;;  %v1582_v40 = vld [vmem:[#allocation7 + $0x1e0] ss:$8 sps:$4 sm:$0xff]  }
  0x45   :  { %741 = vmatpush1.bf16.msra.mxu0 %v1543_v14  ;;  %v1586_v41 = vld [vmem:[#allocation7 + $0x1d4] ss:$8 sps:$4 sm:$0xff]   ;;  %v1585_v42 = vld [vmem:[#allocation7 + $0xd0] ss:$8 sps:$4 sm:$0xff]   ;;  %v1589_v43 = vld [vmem:[#allocation7 + $0xc4] ss:$8 sps:$4 sm:$0xff]  }
  0x46   :  { %742 = vmatprep.subr.bf16.mxu0 %v1547_v15  ;;  %784 = vmatpush1.bf16.msra.mxu1 %v1546_v16  ;;  %v1588_v44 = vld [vmem:[#allocation7 + $0x1d0] ss:$8 sps:$4 sm:$0xff]   ;;  %v1592_v45 = vld [vmem:[#allocation7 + $0x1c4] ss:$8 sps:$4 sm:$0xff]   ;;  %v1591_v46 = vld [vmem:[#allocation7 + $0xc0] ss:$8 sps:$4 sm:$0xff]  }
  0x47   :  { %785 = vmatprep.subr.bf16.mxu1 %v1550_v17  ;;  %v1620_v47 = vld [vmem:[#allocation4 + $0x4] ss:$28 sps:$4 sm:$0xff]   ;;  %v1595_v48 = vld [vmem:[#allocation7 + $0xb4] ss:$8 sps:$4 sm:$0xff]   ;;  %v1597_v52 = vld [vmem:[#allocation7 + $0xb0] ss:$8 sps:$4 sm:$0xff]  }
  0x48   :  { %v1594_v49 = vld [vmem:[#allocation7 + $0x1c0] ss:$8 sps:$4 sm:$0xff]   ;;  %766 = vmatprep.mubr.bf16.mxu0 %v1620_v47  ;;  %v1598_v50 = vld [vmem:[#allocation7 + $0x1b4] ss:$8 sps:$4 sm:$0xff]   ;;  %v1601_v53 = vld [vmem:[#allocation7 + $0xa4] ss:$8 sps:$4 sm:$0xff]  }
  0x49   :  { %743 = vmatpush1.bf16.msra.mxu0 %v1549_v18  ;;  %v1627_v51 = vld [vmem:[#allocation4 + $0xc] ss:$28 sps:$4 sm:$0xff]   ;;  %v1604_v55 = vld [vmem:[#allocation7 + $0x1a4] ss:$8 sps:$4 sm:$0xff]   ;;  %v1603_v56 = vld [vmem:[#allocation7 + $0xa0] ss:$8 sps:$4 sm:$0xff]  }
  0x4a   :  { %744 = vmatprep.subr.bf16.mxu0 %v1553_v19  ;;  %786 = vmatpush1.bf16.msra.mxu1 %v1552_v20  ;;  %v1600_v54 = vld [vmem:[#allocation7 + $0x1b0] ss:$8 sps:$4 sm:$0xff]   ;;  %v1607_v57 = vld [vmem:[#allocation7 + $0x94] ss:$8 sps:$4 sm:$0xff]   ;;  %v1606_v58 = vld [vmem:[#allocation7 + $0x1a0] ss:$8 sps:$4 sm:$0xff]  }
  0x4b   :  { %787 = vmatprep.subr.bf16.mxu1 %v1556_v21  ;;  %809 = vmatprep.mubr.bf16.mxu1 %v1627_v51  ;;  %v1610_v59 = vld [vmem:[#allocation7 + $0x194] ss:$8 sps:$4 sm:$0xff]   ;;  %v1609_v60 = vld [vmem:[#allocation7 + $0x90] ss:$8 sps:$4 sm:$0xff]   ;;  %v1613_v61 = vld [vmem:[#allocation7 + $0x84] ss:$8 sps:$4 sm:$0xff]  }
  0x4c   :  { %v1612_v62 = vld [vmem:[#allocation7 + $0x190] ss:$8 sps:$4 sm:$0xff]   ;;  %v1616_v63 = vld [vmem:[#allocation7 + $0x184] ss:$8 sps:$4 sm:$0xff]   ;;  %v1615_v0 = vld [vmem:[#allocation7 + $0x80] ss:$8 sps:$4 sm:$0xff]  }
  0x4d   :  { %745 = vmatpush1.bf16.msra.mxu0 %v1555_v22  ;;  %v1624_v1 = vld [vmem:[#allocation7 + $0x274] ss:$8 sps:$4 sm:$0xff]   ;;  %v1621_v2 = vld [vmem:[#allocation7 + $0x180] ss:$8 sps:$4 sm:$0xff]   ;;  %v1622_v4 = vld [vmem:[#allocation7 + $0x270] ss:$8 sps:$4 sm:$0xff]  }
  0x4e   :  { %746 = vmatprep.subr.bf16.mxu0 %v1559_v23  ;;  %788 = vmatpush1.bf16.msra.mxu1 %v1558_v24  ;;  %v1618_v3 = vld [vmem:[#allocation4] ss:$28 sps:$4 sm:$0xff]   ;;  %v1625_v5 = vld [vmem:[#allocation4 + $0x8] ss:$28 sps:$4 sm:$0xff]   ;;  %v1633_v10 = vld [vmem:[#allocation7 + $0x254] ss:$8 sps:$4 sm:$0xff]  }
  0x4f   :  { %789 = vmatprep.subr.bf16.mxu1 %v1562_v25  ;;  %v1630_v6 = vld [vmem:[#allocation7 + $0x264] ss:$8 sps:$4 sm:$0xff]   ;;  %v1670_v7 = vld [vmem:[#allocation7 + $0x300] ss:$8 sps:$4 sm:$0xff]   ;;  %v1631_v11 = vld [vmem:[#allocation7 + $0x250] ss:$8 sps:$4 sm:$0xff]  }
  0x50   :  { %v1672_v8 = vld [vmem:[#allocation7 + $0x304] ss:$8 sps:$4 sm:$0xff]   ;;  %v1628_v9 = vld [vmem:[#allocation7 + $0x260] ss:$8 sps:$4 sm:$0xff]   ;;  %v1822_v12 = vmov 0   ;;  %vm730_vm0 = vcmask 130048  }
  0x51   :  { %747 = vmatpush1.bf16.msra.mxu0 %v1561_v26  ;;  %v1636_v13 = vld [vmem:[#allocation7 + $0x244] ss:$8 sps:$4 sm:$0xff]   ;;  %v1676_v14 = vld [vmem:[#allocation4 + $0x18] ss:$28 sps:$4 sm:$0xff]   ;;  %v1637_v18 = vld [vmem:[#allocation7 + $0x230] ss:$8 sps:$4 sm:$0xff]  }
  0x52   :  { %748 = vmatprep.subr.bf16.mxu0 %v1565_v27  ;;  %790 = vmatpush1.bf16.msra.mxu1 %v1564_v28  ;;  %v1679_v15 = vld [vmem:[#allocation4 + $0x14] ss:$28 sps:$4 sm:$0xff]   ;;  %v1634_v16 = vld [vmem:[#allocation7 + $0x240] ss:$8 sps:$4 sm:$0xff]   ;;  %v1642_v19 = vld [vmem:[#allocation7 + $0x224] ss:$8 sps:$4 sm:$0xff]  }
  0x53   :  { %791 = vmatprep.subr.bf16.mxu1 %v1568_v29  ;;  %v1639_v17 = vld [vmem:[#allocation7 + $0x234] ss:$8 sps:$4 sm:$0xff]   ;;  %v1640_v20 = vld [vmem:[#allocation7 + $0x220] ss:$8 sps:$4 sm:$0xff]   ;;  %v1643_v22 = vld [vmem:[#allocation7 + $0x210] ss:$8 sps:$4 sm:$0xff]  }
  0x54   :  { %v1645_v21 = vld [vmem:[#allocation7 + $0x214] ss:$8 sps:$4 sm:$0xff]   ;;  %v1648_v23 = vld [vmem:[#allocation7 + $0x204] ss:$8 sps:$4 sm:$0xff]   ;;  %v1646_v24 = vld [vmem:[#allocation7 + $0x200] ss:$8 sps:$4 sm:$0xff]  }
  0x55   :  { %749 = vmatpush1.bf16.msra.mxu0 %v1567_v30  ;;  %v1651_v25 = vld [vmem:[#allocation7 + $0x2f4] ss:$8 sps:$4 sm:$0xff]   ;;  %v1649_v26 = vld [vmem:[#allocation7 + $0x2f0] ss:$8 sps:$4 sm:$0xff]   ;;  %v1654_v27 = vld [vmem:[#allocation7 + $0x2e4] ss:$8 sps:$4 sm:$0xff]  }
  0x56   :  { %750 = vmatprep.subr.bf16.mxu0 %v1571_v31  ;;  %792 = vmatpush1.bf16.msra.mxu1 %v1570_v32  ;;  %v1652_v28 = vld [vmem:[#allocation7 + $0x2e0] ss:$8 sps:$4 sm:$0xff]   ;;  %v1657_v29 = vld [vmem:[#allocation7 + $0x2d4] ss:$8 sps:$4 sm:$0xff]   ;;  %v1655_v30 = vld [vmem:[#allocation7 + $0x2d0] ss:$8 sps:$4 sm:$0xff]  }
  0x57   :  { %793 = vmatprep.subr.bf16.mxu1 %v1574_v33  ;;  %v1660_v31 = vld [vmem:[#allocation7 + $0x2c4] ss:$8 sps:$4 sm:$0xff]   ;;  %v1658_v32 = vld [vmem:[#allocation7 + $0x2c0] ss:$8 sps:$4 sm:$0xff]   ;;  %v1663_v33 = vld [vmem:[#allocation7 + $0x2b4] ss:$8 sps:$4 sm:$0xff]  }
  0x58   :  { %v1685_v47 = vld [vmem:[#allocation9 + $0x28] sm:$0xff]   ;;  %v1689_v51 = vld [vmem:[#allocation9 + $0x18] sm:$0xff]   ;;  %s919_s29 = smul.u32 889516851, %s1927_s0  ;;  %vm1824_vm7 = vmmov 0   ;;  %s1825_s13 = smov [#allocation12]  }
  0x59   :  { %751 = vmatpush2.bf16.msra.mxu0 %v1573_v34  ;;  %v1661_v34 = vld [vmem:[#allocation7 + $0x2b0] ss:$8 sps:$4 sm:$0xff]   ;;  %s1303_s14 = sshll.u32 %s1825_s13, 4  ;;  %s1304_s14 = int_to_ptr.vmem [resolvable:$true] %s1303_s14 }
  0x5a   :  { %752 = vmatprep.subr.bf16.mxu0 %v1577_v35  ;;  %794 = vmatpush2.bf16.msra.mxu1 %v1576_v36  ;;  %v1666_v35 = vld [vmem:[#allocation7 + $0x2a4] ss:$8 sps:$4 sm:$0xff]   ;;  %v1664_v36 = vld [vmem:[#allocation7 + $0x2a0] ss:$8 sps:$4 sm:$0xff]   ;;  %s1784_s15 = scalar_lea.vmem %s1304_s14, 256  ;;  %p1789_p7 = scmp.lt.s32.totalorder %s1304_s14, %s1304_s14 }
  0x5b   :  { %795 = vmatprep.subr.bf16.mxu1 %v1580_v37  ;;  %v1669_v37 = vld [vmem:[#allocation7 + $0x294] ss:$8 sps:$4 sm:$0xff]   ;;  %p1785_p6 = scmp.ne.s32.totalorder %s1304_s14, %s1784_s15  ;;  %p1790_p8 = scmp.lt.s32.totalorder %s1784_s15, %s1784_s15 }
  0x5d   :  { %753 = vmatpush2.bf16.msra.mxu0 %v1579_v38  ;;  %v1667_v38 = vld [vmem:[#allocation7 + $0x290] ss:$8 sps:$4 sm:$0xff]   ;;  %p1791_p9 = por %p1790_p8, %p1789_p7 }
  0x5e   :  { %754 = vmatprep.subr.bf16.mxu0 %v1583_v39  ;;  %796 = vmatpush2.bf16.msra.mxu1 %v1582_v40  ;;  %v1675_v39 = vld [vmem:[#allocation7 + $0x284] ss:$8 sps:$4 sm:$0xff]   ;;  %v1673_v40 = vld [vmem:[#allocation7 + $0x280] ss:$8 sps:$4 sm:$0xff]  }
  0x5f   :  { %797 = vmatprep.subr.bf16.mxu1 %v1586_v41  ;;  %v1677_v41 = vld [vmem:[#allocation4 + $0x10] ss:$28 sps:$4 sm:$0xff]   ;;  %p1792_p10 = pnand %p1791_p9, %p1785_p6 }
  0x61   :  { %755 = vmatpush2.bf16.msra.mxu0 %v1585_v42  ;;  %v1680_v42 = vld [vmem:[#allocation9 + $0x78] sm:$0xff]  }
  0x62   :  { %756 = vmatprep.subr.bf16.mxu0 %v1589_v43  ;;  %798 = vmatpush2.bf16.msra.mxu1 %v1588_v44  ;;  %v1681_v43 = vld [vmem:[#allocation9 + $0x38] sm:$0xff]   ;;  %v1682_v44 = vld [vmem:[#allocation9 + $0x70] sm:$0xff]  }
  0x63   :  { %799 = vmatprep.subr.bf16.mxu1 %v1592_v45  ;;  %v1683_v45 = vld [vmem:[#allocation9 + $0x30] sm:$0xff]  }
  0x65   :  { %757 = vmatpush2.bf16.msra.mxu0 %v1591_v46  ;;  %v1684_v46 = vld [vmem:[#allocation9 + $0x68] sm:$0xff]  }
  0x66   :  { %758 = vmatprep.subr.bf16.mxu0 %v1595_v48  ;;  %800 = vmatpush2.bf16.msra.mxu1 %v1594_v49  ;;  %v1686_v48 = vld [vmem:[#allocation9 + $0x60] sm:$0xff]  }
  0x67   :  { %801 = vmatprep.subr.bf16.mxu1 %v1598_v50  ;;  %v1687_v49 = vld [vmem:[#allocation9 + $0x20] sm:$0xff]   ;;  %v1688_v50 = vld [vmem:[#allocation9 + $0x58] sm:$0xff]  }
  0x69   :  { %759 = vmatpush2.bf16.msra.mxu0 %v1597_v52  ;;  %v1690_v52 = vld [vmem:[#allocation9 + $0x50] sm:$0xff]  }
  0x6a   :  { %760 = vmatprep.subr.bf16.mxu0 %v1601_v53  ;;  %802 = vmatpush2.bf16.msra.mxu1 %v1600_v54  ;;  %v1691_v53 = vld [vmem:[#allocation9 + $0x10] sm:$0xff]   ;;  %v1692_v54 = vld [vmem:[#allocation9 + $0x48] sm:$0xff]  }
  0x6b   :  { %803 = vmatprep.subr.bf16.mxu1 %v1604_v55  ;;  %v1693_v55 = vld [vmem:[#allocation9 + $0x8] sm:$0xff]  }
  0x6d   :  { %761 = vmatpush2.bf16.msra.mxu0 %v1603_v56  ;;  %v1694_v56 = vld [vmem:[#allocation9 + $0x40] sm:$0xff]  }
  0x6e   :  { %762 = vmatprep.subr.bf16.mxu0 %v1607_v57  ;;  %804 = vmatpush2.bf16.msra.mxu1 %v1606_v58  ;;  %v1695_v57 = vld [vmem:[#allocation9] sm:$0xff]   ;;  %v1823_v58 = vmov 0.0  }
  0x6f   :  { %805 = vmatprep.subr.bf16.mxu1 %v1610_v59  ;;  %v195_v59 = vlaneseq }
  0x71   :  { %763 = vmatpush2.bf16.msra.mxu0 %v1609_v60  ;;  %v917_v60 = vand.u32 127, %v195_v59 }
  0x72   :  { %764 = vmatprep.subr.bf16.mxu0 %v1613_v61  ;;  %806 = vmatpush2.bf16.msra.mxu1 %v1612_v62  ;;  %v920_v62 = vstv %s919_s29 }
  0x73   :  { %807 = vmatprep.subr.bf16.mxu1 %v1616_v63  ;;  %v918_v61 = vadd.s32 128, %v917_v60 }
  0x75   :  { %765 = vmatpush2.bf16.msra.mxu0 %v1615_v0  ;;  %v922_v63 = vadd.s32 %v920_v62, %v918_v61  ;;  %v1890_v0 = vadd.s32 %v920_v62, %v917_v60 }
  0x76   :  { %820 = vmatprep.subr.bf16.mxu0 %v1624_v1  ;;  %808 = vmatpush2.bf16.msra.mxu1 %v1621_v2  ;;  %v196_v1 = vshrl.u32 %v195_v59, 7 }
  0x77   :  { %877 = vmatprep.subr.bf16.mxu1 %v1672_v8 }
  0x78   :  { %767 = vmatmul.mubr.bf16.vlgmr.msra.gmra.mxu0 %v1618_v3  ;;  %v912_v2 = vadd.s32 8, %v196_v1  ;;  %v924_v3 = vadd.s32 1663821227, %v922_v63 }
  0x79   :  { %821 = vmatpush1.bf16.msra.mxu0 %v1622_v4  ;;  %810 = vmatmul.mubr.bf16.vlgmr.msra.gmra.mxu1 %v1625_v5  ;;  %v923_v4 = vadd.s32 1663821227, %v1890_v0  ;;  %v1893_v5 = vmul.u32 2654435769, %v196_v1 }
  0x7a   :  { %822 = vmatprep.subr.bf16.mxu0 %v1630_v6  ;;  %895 = vmatprep.mubr.bf16.mxu1 %v1822_v12  ;;  %v1895_v6 = vmul.u32 2654435769, %v912_v2 }
  0x7b   :  { %878 = vmatpush1.bf16.msra.mxu1 %v1670_v7  ;;  %852 = vmatprep.mubr.bf16.mxu0 %v1679_v15  ;;  %v928_v7 = vmul.u32 2246822507, %v924_v3  ;;  %v927_v8 = vmul.u32 2246822507, %v923_v4 }
  0x7c   :  { %1458 = vmatprep.subr.bf16.mxu1 %v1680_v42 }
  0x7d   :  { %823 = vmatpush1.bf16.msra.mxu0 %v1628_v9  ;;  %v930_v9 = vadd.s32 %v928_v7, %v1893_v5  ;;  %v931_v12 = vadd.s32 %v927_v8, %v1895_v6 }
  0x7e   :  { %824 = vmatprep.subr.bf16.mxu0 %v1633_v10  ;;  %v932_v10 = vadd.s32 %v928_v7, %v1895_v6 }
  0x81   :  { %825 = vmatpush1.bf16.msra.mxu0 %v1631_v11  ;;  %1422 = vmatmul.mubr.msk.bf16.vlgmr.msra.gmra.mxu1 %vm730_vm0, %v1676_v14  ;;  %v929_v11 = vadd.s32 %v927_v8, %v1893_v5  ;;  %v936_v14 = vshrl.u32 %v932_v10, 16 }
  0x82   :  { %826 = vmatprep.subr.bf16.mxu0 %v1636_v13  ;;  %1459 = vmatpush3.bf16.msra.mxu1 %v1681_v43  ;;  %v934_v13 = vshrl.u32 %v930_v9, 16 }
  0x83   :  { %1460 = vmatprep.subr.bf16.mxu1 %v1682_v44  ;;  %v933_v15 = vshrl.u32 %v929_v11, 16 }
  0x85   :  { %827 = vmatpush1.bf16.msra.mxu0 %v1634_v16  ;;  %v935_v16 = vshrl.u32 %v931_v12, 16 }
  0x86   :  { %828 = vmatprep.subr.bf16.mxu0 %v1639_v17  ;;  %1461 = vmatpush3.bf16.msra.mxu1 %v1683_v45 }
  0x87   :  { %1462 = vmatprep.subr.bf16.mxu1 %v1684_v46 }
  0x89   :  { %829 = vmatpush1.bf16.msra.mxu0 %v1637_v18  ;;  %v938_v18 = vxor.u32 %v934_v13, %v930_v9 }
  0x8a   :  { %830 = vmatprep.subr.bf16.mxu0 %v1642_v19  ;;  %1463 = vmatpush3.bf16.msra.mxu1 %v1685_v47  ;;  %v940_v19 = vxor.u32 %v936_v14, %v932_v10 }
  0x8b   :  { %1464 = vmatprep.subr.bf16.mxu1 %v1686_v48 }
  0x8d   :  { %831 = vmatpush1.bf16.msra.mxu0 %v1640_v20  ;;  %v937_v20 = vxor.u32 %v933_v15, %v929_v11 }
  0x8e   :  { %832 = vmatprep.subr.bf16.mxu0 %v1645_v21  ;;  %1465 = vmatpush3.bf16.msra.mxu1 %v1687_v49  ;;  %v939_v21 = vxor.u32 %v935_v16, %v931_v12 }
  0x8f   :  { %1466 = vmatprep.subr.bf16.mxu1 %v1688_v50 }
  0x91   :  { %833 = vmatpush1.bf16.msra.mxu0 %v1643_v22 }
  0x92   :  { %834 = vmatprep.subr.bf16.mxu0 %v1648_v23  ;;  %1467 = vmatpush3.bf16.msra.mxu1 %v1689_v51 }
  0x93   :  { %1468 = vmatprep.subr.bf16.mxu1 %v1690_v52 }
  0x95   :  { %835 = vmatpush1.bf16.msra.mxu0 %v1646_v24  ;;  %v942_v24 = vmul.u32 2146121005, %v938_v18 }
  0x96   :  { %836 = vmatprep.subr.bf16.mxu0 %v1651_v25  ;;  %1469 = vmatpush3.bf16.msra.mxu1 %v1691_v53  ;;  %v944_v25 = vmul.u32 2146121005, %v940_v19 }
  0x97   :  { %1470 = vmatprep.subr.bf16.mxu1 %v1692_v54 }
  0x99   :  { %837 = vmatpush2.bf16.msra.mxu0 %v1649_v26  ;;  %v197_v26 = vsub.s32 0, %v196_v1 }
  0x9a   :  { %838 = vmatprep.subr.bf16.mxu0 %v1654_v27  ;;  %1471 = vmatpush3.bf16.msra.mxu1 %v1693_v55  ;;  %v941_v27 = vmul.u32 2146121005, %v937_v20 }
  0x9b   :  { %1472 = vmatprep.subr.bf16.mxu1 %v1694_v56 }
  0x9d   :  { %839 = vmatpush2.bf16.msra.mxu0 %v1652_v28  ;;  %v943_v28 = vmul.u32 2146121005, %v939_v21 }
  0x9e   :  { %840 = vmatprep.subr.bf16.mxu0 %v1657_v29  ;;  %1473 = vmatpush3.bf16.msra.mxu1 %v1695_v57  ;;  %v193_v29 = vld [vmem:[%s1930_s3] sm:$0x3] }
  0x9f   :  { %1489 = vmatprep.subr.bf16.mxu1 %v1823_v58 }
  0xa1   :  { %841 = vmatpush2.bf16.msra.mxu0 %v1655_v30  ;;  %v201_v30 = vsub.s32 1, %v196_v1 }
  0xa2   :  { %842 = vmatprep.subr.bf16.mxu0 %v1660_v31 }
  0xa5   :  { %843 = vmatpush2.bf16.msra.mxu0 %v1658_v32 }
  0xa6   :  { %844 = vmatprep.subr.bf16.mxu0 %v1663_v33  ;;  %v946_v33 = vshrl.u32 %v942_v24, 15 }
  0xa9   :  { %845 = vmatpush2.bf16.msra.mxu0 %v1661_v34  ;;  %v948_v34 = vshrl.u32 %v944_v25, 15 }
  0xaa   :  { %846 = vmatprep.subr.bf16.mxu0 %v1666_v35  ;;  %v198_v35 = vrot.slane %v193_v29, %v197_v26 }
  0xab   :  { %v952_v42 = vxor.u32 %v948_v34, %v944_v25  ;;  %v1698_v34 = vld [vmem:[#allocation10 + $0x28] sm:$0xff]  }
  0xad   :  { %847 = vmatpush2.bf16.msra.mxu0 %v1664_v36  ;;  %v945_v36 = vshrl.u32 %v941_v27, 15  ;;  %v956_v51 = vmul.u32 2221713035, %v952_v42 }
  0xae   :  { %848 = vmatprep.subr.bf16.mxu0 %v1669_v37  ;;  %v947_v37 = vshrl.u32 %v943_v28, 15 }
  0xaf   :  { %v949_v45 = vxor.u32 %v945_v36, %v941_v27  ;;  %v960_v2 = vshrl.u32 %v956_v51, 16  ;;  %v1700_v36 = vld [vmem:[#allocation10 + $0x18] sm:$0xff]  }
  0xb0   :  { %v951_v46 = vxor.u32 %v947_v37, %v943_v28  ;;  %v1701_v37 = vld [vmem:[#allocation10 + $0x10] sm:$0xff]  }
  0xb1   :  { %849 = vmatpush2.bf16.msra.mxu0 %v1667_v38  ;;  %v202_v38 = vrot.slane %v193_v29, %v201_v30  ;;  %v953_v55 = vmul.u32 2221713035, %v949_v45 }
  0xb2   :  { %850 = vmatprep.subr.bf16.mxu0 %v1675_v39  ;;  %v955_v56 = vmul.u32 2221713035, %v951_v46 }
  0xb3   :  { %v957_v7 = vshrl.u32 %v953_v55, 16 }
  0xb4   :  { %v959_v8 = vshrl.u32 %v955_v56, 16 }
  0xb5   :  { %851 = vmatpush2.bf16.msra.mxu0 %v1673_v40  ;;  %v961_v19 = vxor.u32 %v957_v7, %v953_v55 }
  0xb6   :  { %v963_v20 = vxor.u32 %v959_v8, %v955_v56 }
  0xb7   :  { %vm965_vm3 = vcmp.ge.u32.totalorder %v961_v19, 1073741824 }
  0xb8   :  { %853 = vmatmul.mubr.bf16.vlgmr.msra.gmra.mxu0 %v1677_v41  ;;  %v950_v41 = vxor.u32 %v946_v33, %v942_v24  ;;  %vm967_vm4 = vcmp.ge.u32.totalorder %v963_v20, 1073741824  ;;  %v1697_v33 = vld [vmem:[#allocation10 + $0x30] sm:$0xff]  }
  0xb9   :  { %vm1443_vm6 = vmpackc.low %vm967_vm4, %vm965_vm3 }
  0xba   :  { %v954_v50 = vmul.u32 2221713035, %v950_v41 }
  0xbc   :  { %v958_v1 = vshrl.u32 %v954_v50, 16 }
  0xbe   :  { %v962_v16 = vxor.u32 %v958_v1, %v954_v50 }
  0xc0   :  { %vm966_vm1 = vcmp.ge.u32.totalorder %v962_v16, 1073741824 }
 0x138   :  { %v768_v22 = vpop.f32.mrf.mxu0 }
 0x139   :  { %v811_v17 = vpop.f32.mrf.mxu1  ;;  %v769_v43 = vadd.f32 %v768_v22, %v198_v35 }
 0x13a   :  { %v770_v31 = vpop.f32.mrf.mxu0 }
 0x13b   :  { %v813_v23 = vpop.f32.mrf.mxu1  ;;  %v771_v47 = vadd.f32 %v770_v31, %v202_v38  ;;  %v812_v52 = vadd.f32 %v811_v17, %v769_v43  ;;  %v964_v17 = vxor.u32 %v960_v2, %v956_v51  ;;  %v1696_v31 = vld [vmem:[#allocation10 + $0x38] sm:$0xff]  }
 0x13c   :  { %v772_v39 = vpop.f32.mrf.mxu0 }
 0x13d   :  { %v815_v32 = vpop.f32.mrf.mxu1  ;;  %v773_v49 = vadd.f32 %v772_v39, %v198_v35  ;;  %v814_v57 = vadd.f32 %v813_v23, %v771_v47  ;;  %vm968_vm2 = vcmp.ge.u32.totalorder %v964_v17, 1073741824  ;;  %v1699_v35 = vld [vmem:[#allocation10 + $0x20] sm:$0xff]  }
 0x13e   :  { %v774_v48 = vpop.f32.mrf.mxu0  ;;  %vm1440_vm5 = vmpackc.low %vm968_vm2, %vm966_vm1  ;;  %v1703_v39 = vld [vmem:[#allocation10] sm:$0xff]  }
 0x13f   :  { %v817_v40 = vpop.f32.mrf.mxu1  ;;  %v775_v59 = vadd.f32 %v774_v48, %v202_v38  ;;  %v816_v62 = vadd.f32 %v815_v32, %v773_v49  ;;  %v1702_v38 = vld [vmem:[#allocation10 + $0x8] sm:$0xff]  }
 0x141   :  { %v897_v44 = vpop.f32.mrf.mxu1  ;;  %v818_v9 = vadd.f32 %v817_v40, %v775_v59  ;;  %v1157_v40 = vadd.s32 1180158806, %v1890_v0  ;;  %v1423_v0 = vld [vmem:[%s1932_s5] ss:$0 sm:$0xff] }
 0x143   :  { %v899_v53 = vpop.f32.mrf.mxu1  ;;  %v1158_v41 = vmul.u32 2246822507, %v1157_v40 }
 0x145   :  { %v901_v3 = vpop.f32.mrf.mxu1  ;;  %v1159_v42 = vadd.s32 %v1158_v41, %v1893_v5  ;;  %v1160_v43 = vadd.s32 %v1158_v41, %v1895_v6 }
 0x147   :  { %v903_v18 = vpop.f32.mrf.mxu1  ;;  %v1162_v45 = vshrl.u32 %v1160_v43, 16 }
 0x149   :  { %v1164_v47 = vxor.u32 %v1162_v45, %v1160_v43 }
 0x14b   :  { %v1166_v49 = vmul.u32 2146121005, %v1164_v47 }
 0x14d   :  { %v1168_v51 = vshrl.u32 %v1166_v49, 15 }
 0x178   :  { %v854_v54 = vpop.f32.mrf.mxu0 }
 0x179   :  { %v855_v60 = vadd.f32 %v854_v54, %v812_v52 }
 0x17a   :  { %v856_v61 = vpop.f32.mrf.mxu0 }
 0x17b   :  { %v857_v63 = vadd.f32 %v856_v61, %v814_v57  ;;  %v898_v12 = vadd.f32 %v897_v44, %v855_v60  ;;  %v1161_v44 = vshrl.u32 %v1159_v42, 16 }
 0x17c   :  { %v858_v4 = vpop.f32.mrf.mxu0 }
 0x17d   :  { %v900_v10 = vadd.f32 %v899_v53, %v857_v63  ;;  %v859_v11 = vadd.f32 %v858_v4, %v816_v62  ;;  %v906_v24 = vmax.f32 %v898_v12, 0.0  ;;  %v1163_v46 = vxor.u32 %v1161_v44, %v1159_v42 }
 0x17e   :  { %v860_v13 = vpop.f32.mrf.mxu0  ;;  %v1170_v53 = vxor.u32 %v1168_v51, %v1166_v49 }
 0x17f   :  { %v902_v14 = vadd.f32 %v901_v3, %v859_v11  ;;  %v861_v15 = vadd.f32 %v860_v13, %v818_v9  ;;  %v907_v21 = vmax.f32 %v900_v10, 0.0  ;;  %v969_v29 = vmul.f32 1.3333334, %v906_v24  ;;  %v1446_v10 = vld [vmem:[%s1934_s7] ss:$0 sm:$0xff] }
 0x180   :  { %v1165_v48 = vmul.u32 2146121005, %v1163_v46  ;;  %v1172_v55 = vmul.u32 2221713035, %v1170_v53 }
 0x181   :  { %v908_v22 = vmax.f32 %v902_v14, 0.0  ;;  %v904_v23 = vadd.f32 %v903_v18, %v861_v15  ;;  %v970_v27 = vmul.f32 1.3333334, %v907_v21 }
 0x182   :  { %v1167_v50 = vshrl.u32 %v1165_v48, 15  ;;  %v1174_v57 = vshrl.u32 %v1172_v55, 16 }
 0x183   :  { %v909_v25 = vmax.f32 %v904_v23, 0.0  ;;  %v971_v26 = vmul.f32 1.3333334, %v908_v22 }
 0x184   :  { %v1169_v52 = vxor.u32 %v1167_v50, %v1165_v48  ;;  %v1176_v1 = vxor.u32 %v1174_v57, %v1172_v55 }
 0x185   :  { %v972_v28 = vmul.f32 1.3333334, %v909_v25  ;;  %v1444_v32 = vpack.c.bf16 %v971_v26, %v969_v29 }
 0x186   :  { %v1171_v54 = vmul.u32 2221713035, %v1169_v52  ;;  %vm1178_vm9 = vcmp.ge.u32.totalorder %v1176_v1, 1073741824 }
 0x187   :  { %v1441_v30 = vpack.c.bf16 %v972_v28, %v970_v27 }
 0x188   :  { %v1173_v6 = vshrl.u32 %v1171_v54, 16 }
 0x189   :  { %1442 = vmatprep.mubr.msk.bf16.mxu1 %vm1440_vm5, %v1441_v30 }
 0x18a   :  { %1445 = vmatmul.mubr.msk.bf16.vlgmr.msra.gmra.mxu1 %vm1443_vm6, %v1444_v32  ;;  %v1175_v63 = vxor.u32 %v1173_v6, %v1171_v54 }
 0x18b   :  { %1490 = vmatpush3.bf16.msra.mxu1 %v1696_v31  ;;  %1505 = vmatprep.mubr.msk.bf16.mxu1 %vm1824_vm7, %v1823_v58 }
 0x18c   :  { %1491 = vmatprep.subr.bf16.mxu1 %v1823_v58  ;;  %vm1177_vm8 = vcmp.ge.u32.totalorder %v1175_v63, 1073741824 }
 0x18d   :  { %vm1455_vm10 = vmpackc.low %vm1178_vm9, %vm1177_vm8 }
 0x18f   :  { %1492 = vmatpush3.bf16.msra.mxu1 %v1697_v33 }
 0x190   :  { %1493 = vmatprep.subr.bf16.mxu1 %v1823_v58 }
 0x193   :  { %1494 = vmatpush3.bf16.msra.mxu1 %v1698_v34 }
 0x194   :  { %1495 = vmatprep.subr.bf16.mxu1 %v1823_v58 }
 0x197   :  { %1496 = vmatpush3.bf16.msra.mxu1 %v1699_v35 }
 0x198   :  { %1497 = vmatprep.subr.bf16.mxu1 %v1823_v58 }
 0x19b   :  { %1498 = vmatpush3.bf16.msra.mxu1 %v1700_v36 }
 0x19c   :  { %1499 = vmatprep.subr.bf16.mxu1 %v1823_v58 }
 0x19f   :  { %1500 = vmatpush3.bf16.msra.mxu1 %v1701_v37 }
 0x1a0   :  { %1501 = vmatprep.subr.bf16.mxu1 %v1823_v58 }
 0x1a3   :  { %1502 = vmatpush3.bf16.msra.mxu1 %v1702_v38 }
 0x1a4   :  { %1503 = vmatprep.subr.bf16.mxu1 %v1823_v58 }
 0x1a7   :  { %1504 = vmatpush3.bf16.msra.mxu1 %v1703_v39 }
 0x24a   :  { %v1474_v58 = vpop.f32.mrf.mxu1 }
 0x24c   :  { %v1475_v5 = vpop.f32.mrf.mxu1 }
 0x24d   :  { %v1476_v56 = vadd.f32 %v1475_v5, %v1474_v58 }
 0x24e   :  { %v1477_v59 = vpop.f32.mrf.mxu1 }
 0x24f   :  { %v1149_v60 = vadd.f32 %v1476_v56, %v1423_v0 }
 0x250   :  { %v1478_v61 = vpop.f32.mrf.mxu1 }
 0x251   :  { %v1479_v62 = vadd.f32 %v1478_v61, %v1477_v59  ;;  %v1155_v2 = vmax.f32 %v1149_v60, 0.0 }
 0x253   :  { %v1152_v3 = vadd.f32 %v1479_v62, %v1423_v0  ;;  %v1179_v7 = vmul.f32 1.3333334, %v1155_v2 }
 0x255   :  { %v1156_v4 = vmax.f32 %v1152_v3, 0.0 }
 0x257   :  { %v1180_v8 = vmul.f32 1.3333334, %v1156_v4 }
 0x259   :  { %v1456_v9 = vpack.c.bf16 %v1180_v8, %v1179_v7 }
 0x25b   :  { %1506 = vmatmul.mubr.msk.bf16.vlgmr.msra.gmra.mxu1 %vm1455_vm10, %v1456_v9 }
 0x31b   :  { %v1289_v11 = vpop.f32.mrf.mxu1 }
 0x31c   :  { %v1290_v12 = vadd.f32 %v1446_v10, %v1289_v11 }
 0x31d   :  { %v1507_v13 = vpop.f32.mrf.mxu1 }
 0x31e   :  { %1296 = vst [vmem:[#allocation12] sm:$0xff] %v1290_v12 }
 0x31f   :  { %v1292_v14 = vpop.f32.mrf.mxu1 }
 0x320   :  { %v1293_v15 = vadd.f32 %v1446_v10, %v1292_v14 }
 0x321   :  { %v1508_v16 = vpop.f32.mrf.mxu1 }
 0x322   :  { %1297 = vst [vmem:[#allocation12 + $0x8] sm:$0xff] %v1293_v15 }
 0x323   :  { %1795 = shalt.err (!%p1792_p10)
}
 0x324   :  { %1309 = dma.vmem_to_hbm [thread:$0]  %s1304_s14, 256, %s1935_s8, [#allocation6], %s1813_s30, %s1813_s30, %s1814_s9  }
 0x325   :  { %1810 = dma.done.wait [#allocation6], 256  }
 0x326   :  { %1811 = vsyncadd [#allocation6], 4294967040 }
 0x327   :  { %1313 = vsyncpa [#allocation5], 1 }
 0x328   :  { %1314 = vsyncpa [#allocation8], 1 }
 0x329   :  { %1315 = vsyncpa [#allocation11], 1 }
 0x32a   :  { %1316 = vsyncpa [#allocation6], 1 }

</bundles_post_ra>
